<compile_context>
chip_gen: v7x
topology: tpu7x:2x2x1
jax: 0.10.0
libtpu: 0.0.40
codegen_flags: <defaults>
</compile_context>

<pallas_src>
import functools

import jax
import jax.numpy as jnp
from jax.experimental import pallas as pl
from jax.experimental.pallas import tpu as pltpu


def _round_up(x: int, m: int) -> int:
    return ((x + m - 1) // m) * m


def exit_kernel(x_ref, w_ref, b_ref, o_ref, acc_ref, *, inv_hw):
    # x_ref  : (TB, THW, Cp)  activation tile: HW on sublanes, C on lanes
    # w_ref  : (Cp, Np)       classifier weight (grid-invariant, VMEM resident)
    # b_ref  : (1, Np)        classifier bias   (grid-invariant)
    # o_ref  : (TB, Np)       logits tile (resident across the HW axis)
    # acc_ref: (TB, Cp) f32   pooled-sum accumulator (VMEM scratch)
    k = pl.program_id(1)

    @pl.when(k == 0)
    def _init():
        acc_ref[...] = jnp.zeros_like(acc_ref)

    # Partial spatial sum for this HW tile.  Reduction is over the sublane
    # axis, so it is mostly VPU vector adds; zero-padded HW rows add nothing.
    acc_ref[...] += jnp.sum(x_ref[...], axis=1)

    @pl.when(k == pl.num_programs(1) - 1)
    def _finalize():
        pooled = acc_ref[...] * inv_hw                       # mean = sum / true HW
        logits = jnp.dot(pooled, w_ref[...],
                         preferred_element_type=jnp.float32)  # Linear on MXU
        o_ref[...] = logits + b_ref[...]                      # (1,Np) broadcast bias


def exit_forward(x_nchw, weight, bias, *, tile_b: int = 8):
    """Exit.forward (classifier = avgpool + flatten + linear) on TPU.

    x_nchw: (B, C, H, W) float32   weight: (C, N)   bias: (N,)
    returns logits: (B, N) float32
    """
    B, C, H, W = x_nchw.shape
    HW = H * W
    N = weight.shape[1]

    # Layout: (B, HW, C) so channels sit on lanes and the reduce is on sublanes.
    x = x_nchw.reshape(B, C, HW).transpose(0, 2, 1).astype(jnp.float32)

    # Pad for lane/sublane density.  Zero padding is exact: padded HW rows add
    # zero to the sum, padded C columns hit zero weight rows, padded B rows /
    # N columns are sliced off the result.
    tile_hw = 128 if HW >= 128 else _round_up(HW, 8)
    Bp = _round_up(B, tile_b)
    HWp = _round_up(HW, tile_hw)
    Cp = _round_up(C, 128)
    Np = _round_up(N, 128)

    x = jnp.pad(x, ((0, Bp - B), (0, HWp - HW), (0, Cp - C)))
    w = jnp.pad(weight.astype(jnp.float32), ((0, Cp - C), (0, Np - N)))
    b2d = jnp.pad(bias.astype(jnp.float32).reshape(1, N), ((0, 0), (0, Np - N)))

    grid = (Bp // tile_b, HWp // tile_hw)

    out = pl.pallas_call(
        functools.partial(exit_kernel, inv_hw=1.0 / HW),
        out_shape=jax.ShapeDtypeStruct((Bp, Np), jnp.float32),
        grid_spec=pltpu.PrefetchScalarGridSpec(
            num_scalar_prefetch=0,
            grid=grid,
            in_specs=[
                pl.BlockSpec((tile_b, tile_hw, Cp), lambda i, k: (i, k, 0)),
                pl.BlockSpec((Cp, Np), lambda i, k: (0, 0)),   # weight: resident
                pl.BlockSpec((1, Np), lambda i, k: (0, 0)),    # bias: resident
            ],
            out_specs=pl.BlockSpec((tile_b, Np), lambda i, k: (i, 0)),
            scratch_shapes=[pltpu.VMEM((tile_b, Cp), jnp.float32)],
        ),
        compiler_params=pltpu.CompilerParams(
            dimension_semantics=("parallel", "arbitrary")),
    )(x, w, b2d)

    return out[:B, :N]


def reference_forward(x_nchw, weight, bias):
    pooled = jnp.mean(x_nchw, axis=(2, 3))          # (B, C)
    return pooled @ weight + bias                   # (B, N)


if __name__ == "__main__":
    key = jax.random.PRNGKey(0)
    kx, kw, kb = jax.random.split(key, 3)

    B, C, H, W = 2, 32, 16, 16
    NUM_CLASSES = 10

    x = jax.random.normal(kx, (B, C, H, W), dtype=jnp.float32)

    # Deterministic Linear init (PyTorch-style uniform bound 1/sqrt(fan_in)).
    bound = 1.0 / jnp.sqrt(jnp.float32(C))
    weight = jax.random.uniform(kw, (C, NUM_CLASSES), jnp.float32, -bound, bound)
    bias = jax.random.uniform(kb, (NUM_CLASSES,), jnp.float32, -bound, bound)

    out = exit_forward(x, weight, bias)
    out = jax.block_until_ready(out)

    ref = reference_forward(x, weight, bias)
    assert out.shape == (B, NUM_CLASSES)
    assert jnp.allclose(out, ref, atol=1e-5, rtol=1e-5), "mismatch vs reference"

    print("KERNEL_OK")
</pallas_src>

<mosaic_0001>
module attributes {stable_mosaic.version = 11 : i64} {
  func.func @exit_kernel(%arg0: i32, %arg1: i32, %arg2: memref<8x128x128xf32, #tpu.memory_space<vmem>>, %arg3: memref<128x128xf32, #tpu.memory_space<vmem>>, %arg4: memref<1x128xf32, #tpu.memory_space<vmem>>, %arg5: memref<8x128xf32, #tpu.memory_space<vmem>>, %arg6: memref<8x128xf32, #tpu.memory_space<vmem>>) attributes {dimension_semantics = [#tpu.dimension_semantics<parallel>, #tpu.dimension_semantics<arbitrary>], iteration_bounds = array<i64: 1, 2>, scalar_prefetch = 0 : i64, scratch_operands = 1 : i64, tpu.core_type = #tpu.core_type<tc>, window_params = [{transform_indices = @transform_0, window_bounds = array<i64: 8, 128, 128>}, {pipeline_mode = #tpu.pipeline_mode<synchronous>, transform_indices = @transform_1, window_bounds = array<i64: 128, 128>}, {pipeline_mode = #tpu.pipeline_mode<synchronous>, transform_indices = @transform_2, window_bounds = array<i64: 1, 128>}, {transform_indices = @transform_3, window_bounds = array<i64: 8, 128>}]} {
    %c0_i32 = arith.constant 0 : i32
    %0 = arith.cmpi eq, %arg1, %c0_i32 : i32
    %1 = arith.extui %0 : i1 to i32
    %c0_i32_0 = arith.constant 0 : i32
    %2 = arith.cmpi ne, %1, %c0_i32_0 : i32
    scf.if %2 {
      %cst_8 = arith.constant 0.000000e+00 : f32
      %11 = vector.broadcast %cst_8 : f32 to vector<8x128xf32>
      %c0_9 = arith.constant 0 : index
      %c0_10 = arith.constant 0 : index
      %12 = vector.load %arg6[%c0_9, %c0_10] : memref<8x128xf32, #tpu.memory_space<vmem>>, vector<8x128xf32>
      tpu.vector_store %arg6[%c0_9, %c0_10], %11 {strides = array<i32>} : memref<8x128xf32, #tpu.memory_space<vmem>>, vector<8x128xf32>,
    } else {
    }
    %c0 = arith.constant 0 : index
    %c0_1 = arith.constant 0 : index
    %3 = vector.load %arg6[%c0, %c0_1] : memref<8x128xf32, #tpu.memory_space<vmem>>, vector<8x128xf32>
    %c0_2 = arith.constant 0 : index
    %c0_3 = arith.constant 0 : index
    %c0_4 = arith.constant 0 : index
    %4 = vector.load %arg2[%c0_2, %c0_3, %c0_4] : memref<8x128x128xf32, #tpu.memory_space<vmem>>, vector<8x128x128xf32>
    %cst = arith.constant dense<0.000000e+00> : vector<8x128xf32>
    %5 = vector.multi_reduction <add>, %4, %cst [1] : vector<8x128x128xf32> to vector<8x128xf32>
    %6 = arith.addf %3, %5 : vector<8x128xf32>
    %c0_5 = arith.constant 0 : index
    %c0_6 = arith.constant 0 : index
    %7 = vector.load %arg6[%c0_5, %c0_6] : memref<8x128xf32, #tpu.memory_space<vmem>>, vector<8x128xf32>
    tpu.vector_store %arg6[%c0_5, %c0_6], %6 {strides = array<i32>} : memref<8x128xf32, #tpu.memory_space<vmem>>, vector<8x128xf32>,
    %c1_i32 = arith.constant 1 : i32
    %8 = arith.cmpi eq, %arg1, %c1_i32 : i32
    %9 = arith.extui %8 : i1 to i32
    %c0_i32_7 = arith.constant 0 : i32
    %10 = arith.cmpi ne, %9, %c0_i32_7 : i32
    scf.if %10 {
      %c0_8 = arith.constant 0 : index
      %c0_9 = arith.constant 0 : index
      %11 = vector.load %arg6[%c0_8, %c0_9] : memref<8x128xf32, #tpu.memory_space<vmem>>, vector<8x128xf32>
      %cst_10 = arith.constant 3.906250e-03 : f32
      %12 = vector.broadcast %cst_10 : f32 to vector<8x128xf32>
      %13 = arith.mulf %11, %12 : vector<8x128xf32>
      %c0_11 = arith.constant 0 : index
      %c0_12 = arith.constant 0 : index
      %14 = vector.load %arg3[%c0_11, %c0_12] : memref<128x128xf32, #tpu.memory_space<vmem>>, vector<128x128xf32>
      %cst_13 = arith.constant dense<0.000000e+00> : vector<8x128xf32>
      %15 = tpu.matmul %13, %14, %cst_13 {dimension_numbers = #tpu.dot_dimension_numbers<[1], [0], [0], [1], [0, 0, 1, 1], [], []>} : vector<8x128xf32>, vector<128x128xf32>, vector<8x128xf32> -> vector<8x128xf32>
      %c0_14 = arith.constant 0 : index
      %c0_15 = arith.constant 0 : index
      %16 = vector.load %arg4[%c0_14, %c0_15] : memref<1x128xf32, #tpu.memory_space<vmem>>, vector<1x128xf32>
      %17 = vector.broadcast %16 : vector<1x128xf32> to vector<8x128xf32>
      %18 = arith.addf %15, %17 : vector<8x128xf32>
      %c0_16 = arith.constant 0 : index
      %c0_17 = arith.constant 0 : index
      %19 = vector.load %arg5[%c0_16, %c0_17] : memref<8x128xf32, #tpu.memory_space<vmem>>, vector<8x128xf32>
      tpu.vector_store %arg5[%c0_16, %c0_17], %18 {strides = array<i32>} : memref<8x128xf32, #tpu.memory_space<vmem>>, vector<8x128xf32>,
    } else {
    }
    return
  }
  func.func @transform_0(%arg0: i32, %arg1: i32) -> (i32, i32, i32) {
    %c0_i32 = arith.constant 0 : i32
    %c0_i32_0 = arith.constant 0 : i32
    return %arg0, %arg1, %c0_i32 : i32, i32, i32
  }
  func.func @transform_1(%arg0: i32, %arg1: i32) -> (i32, i32) {
    %c0_i32 = arith.constant 0 : i32
    %c0_i32_0 = arith.constant 0 : i32
    %c0_i32_1 = arith.constant 0 : i32
    return %c0_i32, %c0_i32_0 : i32, i32
  }
  func.func @transform_2(%arg0: i32, %arg1: i32) -> (i32, i32) {
    %c0_i32 = arith.constant 0 : i32
    %c0_i32_0 = arith.constant 0 : i32
    %c0_i32_1 = arith.constant 0 : i32
    return %c0_i32, %c0_i32_0 : i32, i32
  }
  func.func @transform_3(%arg0: i32, %arg1: i32) -> (i32, i32) {
    %c0_i32 = arith.constant 0 : i32
    %c0_i32_0 = arith.constant 0 : i32
    return %arg0, %c0_i32 : i32, i32
  }
}

</mosaic_0001>

<bundles_post_ra>
// kernel: tpu_custom_call.1
= control target key start
LH: loop header
LB: loop body
LE: loop exit
PB: predicated region body
PF: predicated region fallthrough
CT: control target
= control target key end

     0   :  { %8 = vsyncpa [#allocation4], 0  ;;  %s1384_s0 = inlined_call_operand.hbm [shape: f32[8,256,128], index: 0, kind: input, shape index: {}]   ;;  %s1385_s1 = inlined_call_operand.hbm [shape: f32[128,128], index: 1, kind: input, shape index: {}]   ;;  %s1386_s2 = inlined_call_operand.vmem [shape: f32[1,128], index: 2, kind: input, shape index: {}]   ;;  %s1387_s3 = inlined_call_operand.hbm [shape: f32[8,128], index: 3, kind: output, shape index: {}]  }
   0x1   :  { %10 = vsyncpa [#allocation4 + $0x1], 0 }
   0x2   :  { %11 = vsyncpa [#allocation7], 0 }
   0x3   :  { %12 = vsyncpa [#allocation5], 0  ;;  %s1082_s12 = smov 0   ;;  %s1084_s13 = smov 0  }
   0x4   :  { %s1086_s14 = smov 0   ;;  %s1088_s15 = smov 0  }
   0x5   :  { %s1090_s16 = smov 0   ;;  %s1092_s17 = smov 0  }
   0x6 LB: > { %s751_s18 = sadd.s32 4294967295, %s1046_s17   ;;  %s27_s19 = sadd.s32 1, %s1042_s16  ;;  %s1046_s17 = sphi %s1092_s17, %s18_s17   ;;  %s1042_s16 = sphi %s1090_s16, %s1407_s16   ;;  %s1038_s15 = sphi %s1088_s15, %s1406_s15   ;;  %s1034_s14 = sphi %s1086_s14, %s1405_s14   ;;  %s1030_s13 = sphi %s1084_s13, %s1404_s13   ;;  %s1026_s12 = sphi %s1082_s12, %s1403_s12  }
   0x7   : > { %p28_p0 = scmp.ge.s32.totalorder %s27_s19, 2  ;;  %s39_s20 = sadd.s32 1, %s1034_s14 }
   0x8   : > { %p46_p1 = scmp.ne.s32.totalorder %s1034_s14, %s1030_s13  ;;  %p47_p2 = scmp.eq.s32.totalorder %s1046_s17, 0 }
   0x9   : > { %s1409_s19 = smov (%p28_p0, %s27_s19), 0  ;;  %p52_p4 = scmp.ne.s32.totalorder %s1030_s13, %s1026_s12 }
   0xa   : > { %p1118_p3 = por %p47_p2, %p46_p1  ;;  %s35_s22 = ssub.s32 %s1042_s16, %s1409_s19 }
   0xb   : > { %p1127_p5 = scmp.eq.s32.totalorder %s751_s18, 0  ;;  %p37_p6 = scmp.eq.s32.totalorder %s35_s22, 0 }
   0xc   : > { %s1393_s21 = scalar_select %p1118_p3, 1, 0 }
   0xd   : > { %s1394_s23 = scalar_select %p1127_p5, 1, 0 }
   0xe   : > { %p752_p7 = scmp.ge.s32.totalorder %s1046_s17, 1  ;;  %p1134_p8 = por %p1127_p5, %p52_p4 }
   0xf   : > { %p131_p9 = scmp.lt.s32.totalorder %s1046_s17, 3  ;;  %s1048_s27 = smov [#allocation6]  }
  0x10   : > { %s1395_s24 = scalar_select %p1134_p8, 1, 0 }
  0x11   : > { %s1140_s25 = scalar_select %p37_p6, %s1034_s14, %s39_s20  }
  0x12   : > { %p1142_p10 = pnand %p752_p7, %p131_p9  ;;  %s143_s28 = sshll.u32 %s1048_s27, 4  ;;  %s144_s28 = int_to_ptr.vmem [resolvable:$true] %s143_s28 }
  0x13   : > { %s934_s5 = scalar_lea.hbm %s1385_s1, 2048 }
  0x14   : > { %s1396_s26 = scalar_select %p1142_p10, 1, 0 }
  0x15   : > { %p864_p11 = pneg %p1142_p10  ;;  %p935_p13 = scmp.ne.s32.totalorder %s1385_s1, %s934_s5 }
  0x16   : > { %p941_p4 = scmp.lt.u32.totalorder %s934_s5, %s1385_s1 }
  0x17   : > { %p1150_p12 = pnand %p864_p11, %p1127_p5 }
  0x19   : > { %p936_p0 = pneg %p1150_p12 }
  0x1b   : > { %p937_p1 = pnand %p936_p0, %p935_p13 }
  0x1d   : > { %p938_p2 = pneg %p937_p1 }
  0x1f   : > { %p943_p6 = pnand %p941_p4, %p938_p2 }
  0x21   : > { %946 = shalt.err (!%p943_p6)
}
  0x22   : > { %s947_s10 = scalar_lea.vmem %s144_s28, 2048  ;;  %p955_p5 = scmp.lt.s32.totalorder %s144_s28, %s144_s28 }
  0x23   : > { %p948_p7 = scmp.ne.s32.totalorder %s144_s28, %s947_s10  ;;  %p956_p8 = scmp.lt.s32.totalorder %s947_s10, %s947_s10 }
  0x25   : > { %p950_p9 = pnand %p948_p7, %p936_p0  ;;  %p957_p10 = por %p956_p8, %p955_p5 }
  0x27   : > { %p951_p11 = pneg %p950_p9 }
  0x29   : > { %p958_p3 = pnand %p957_p10, %p951_p11 }
  0x2b   : > { %961 = shalt.err (!%p958_p3)
}
  0x2c   : > { %s1049_s11 = smov 128   ;;  %s1050_s12 = smov 8  }
  0x2d   : > { %867 = dma.hbm_to_vmem [thread:$0]  (!%p1150_p12), %s1385_s1, 2048, %s144_s28, [#allocation7], %s1049_s11, %s1049_s11, %s1050_s12  }
  0x2e   : > { %p754_p13 = scmp.ge.s32.totalorder %s1046_s17, 2 }
  0x30   : > { %156 = sbr.rel (%p754_p13) target bundleno = 70 (0x46), region = 24 }
  0x37   : > { %s160_s27 = sand.u32 1, %s1034_s14   ;;  %s770_s30 = sshll.u32 %s1042_s16, 11 }
  0x38   : > { %s755_s4 = sshll.u32 %s160_s27, 10  ;;  %s173_s6 = scalar_lea.hbm %s1384_s0, %s770_s30 }
  0x39   : > { %p1398_p3 = scmp.ne.s32.totalorder %s1393_s21, 0  ;;  %s164_s7 = scalar_lea.vmem [#allocation3], %s755_s4 }
  0x3a   : > { %s186_s8 = sshll.u32 %s164_s7, 4  ;;  %s1051_s10 = smov 4096   ;;  %s187_s8 = int_to_ptr.vmem [resolvable:$true] %s186_s8 }
  0x3b   : > { %s849_s28 = scalar_select %p1398_p3, [#allocation0], [#allocation11] }
  0x3c   : > { %850 = sst [smem:[#allocation10]] (%p1398_p3), %s1051_s10  ;;  %s1052_s11 = smov 2048  }
  0x3d   : > { %s178_s9 = sld [smem:[%s849_s28]]   ;;  %s1053_s12 = smov 16  }
  0x3e   : > { %851 = sst [smem:[#allocation10 + $0x1]] (%p1398_p3), %s1052_s11  ;;  %s1054_s20 = smov 128  }
  0x3f   : > { %852 = sst [smem:[#allocation10 + $0x2]] (%p1398_p3), %s1053_s12  ;;  %s1055_s30 = smov 8  }
  0x40   : > { %853 = sst [smem:[#allocation10 + $0x3]] (%p1398_p3), %s1054_s20  ;;  %s161_s5 = scalar_lea.sflag [#allocation4], %s160_s27 }
  0x41   : > { %854 = sst [smem:[#allocation10 + $0x4]] (%p1398_p3), %s1054_s20  ;;  %s1056_s29 = smov [#allocation9]  }
  0x42   : > { %855 = sst [smem:[#allocation10 + $0x5]] (%p1398_p3), %s1055_s30 }
  0x43   : > { %s758_s22 = sshll.u32 %s178_s9, 26 }
  0x44   : > { %s759_s4 = sadd.s32 134217728, %s758_s22 }
  0x45   : > { %856 = dma.general (%p1398_p3), %s173_s6, 16384, %s187_s8, %s161_s5, %s1056_s29, [#allocation10], %s759_s4, 0  }
  0x46 PF: > { %p1399_p5 = scmp.ne.s32.totalorder %s1396_s26, 0 }
  0x47   : > { %s213_s28 = sand.u32 (!%p1399_p5), 1, %s1030_s13   ;;  %p1400_p8 = scmp.ne.s32.totalorder (!%p1399_p5), %s1395_s24, 0 }
  0x48   : > { %211 = sbr.rel (%p1399_p5) target bundleno = 419 (0x1a3), region = 32  ;;  %s761_s7 = sshll.u32 (!%p1399_p5), %s213_s28, 10 }
  0x49   : > { %s214_s10 = scalar_lea.sflag (!%p1399_p5), [#allocation4], %s213_s28  ;;  %s1195_s11 = scalar_lea.vmem (!%p1399_p5), [#allocation3], %s761_s7 }
  0x4f   : > { %1013 = dma.done.wait (%p1400_p8), %s214_s10, 16384  }
  0x50   : > { %1015 = vsyncadd (%p1400_p8), %s214_s10, 4294950912  ;;  %p1401_p10 = scmp.ne.s32.totalorder %s1394_s23, 0 }
  0x52   : > { %1017 = dma.done.wait (%p1401_p10), [#allocation7], 2048  }
  0x53   : > { %1019 = vsyncadd (%p1401_p10), [#allocation7], 4294965248  ;;  %p763_p12 = scmp.ne.s32.totalorder %s1038_s15, 0 }
  0x54   : > { %v1057_v0 = vmov (!%p763_p12), 0.0  }
  0x55   : > { %244 = sbr.rel (%p763_p12) target bundleno = 92 (0x5c), region = 44  ;;  %245 = vst [vmem:[#allocation2] sm:$0xff] (!%p763_p12), %v1057_v0 }
  0x5c PF: > { %v247_v1 = vld [vmem:[%s1195_s11] sm:$0xff]  ;;  %v248_v2 = vld [vmem:[%s1195_s11 + $0x8] sm:$0xff]  ;;  %v249_v3 = vld [vmem:[%s1195_s11 + $0x10] sm:$0xff]  ;;  %vm551_vm0 = vcmask 1041409   ;;  %vm553_vm1 = vcmask 1042434   ;;  %vm555_vm2 = vcmask 1043459  }
  0x5d   : > { %v375_v4 = vadd.f32 %v248_v2, %v247_v1  ;;  %v250_v5 = vld [vmem:[%s1195_s11 + $0x18] sm:$0xff]  ;;  %v251_v7 = vld [vmem:[%s1195_s11 + $0x20] sm:$0xff]  ;;  %v252_v10 = vld [vmem:[%s1195_s11 + $0x28] sm:$0xff]  ;;  %vm557_vm3 = vcmask 1044484   ;;  %vm559_vm4 = vcmask 1045509   ;;  %vm561_vm5 = vcmask 1046534  }
  0x5e   : > { %v263_v8 = vld [vmem:[%s1195_s11 + $0x80] sm:$0xff]  ;;  %v264_v11 = vld [vmem:[%s1195_s11 + $0x88] sm:$0xff]  ;;  %v265_v12 = vld [vmem:[%s1195_s11 + $0x90] sm:$0xff]  ;;  %vm563_vm6 = vcmask 1047559   ;;  %p764_p0 = scmp.ne.s32.totalorder %s1038_s15, 1 }
  0x5f   : > { %v376_v6 = vadd.f32 %v375_v4, %v249_v3  ;;  %v396_v14 = vadd.f32 %v264_v11, %v263_v8  ;;  %v253_v15 = vld [vmem:[%s1195_s11 + $0x30] sm:$0xff]  ;;  %v266_v16 = vld [vmem:[%s1195_s11 + $0x98] sm:$0xff]  ;;  %v267_v20 = vld [vmem:[%s1195_s11 + $0xa0] sm:$0xff]  ;;  %vm1059_vm7 = vmmov (!%p764_p0), 0  }
  0x60   : > { %v254_v19 = vld [vmem:[%s1195_s11 + $0x38] sm:$0xff]  ;;  %v279_v21 = vld [vmem:[%s1195_s11 + $0x100] sm:$0xff]  ;;  %v280_v22 = vld [vmem:[%s1195_s11 + $0x108] sm:$0xff] }
  0x61   : > { %v377_v9 = vadd.f32 %v376_v6, %v250_v5  ;;  %v397_v18 = vadd.f32 %v396_v14, %v265_v12  ;;  %v281_v23 = vld [vmem:[%s1195_s11 + $0x110] sm:$0xff]  ;;  %v255_v26 = vld [vmem:[%s1195_s11 + $0x40] sm:$0xff]  ;;  %v268_v27 = vld [vmem:[%s1195_s11 + $0xa8] sm:$0xff]  ;;  %v417_v28 = vadd.f32 %v280_v22, %v279_v21 }
  0x62   : > { %v282_v29 = vld [vmem:[%s1195_s11 + $0x118] sm:$0xff]  ;;  %v256_v32 = vld [vmem:[%s1195_s11 + $0x48] sm:$0xff]  ;;  %v269_v33 = vld [vmem:[%s1195_s11 + $0xb0] sm:$0xff] }
  0x63   : > { %v378_v13 = vadd.f32 %v377_v9, %v251_v7  ;;  %v398_v25 = vadd.f32 %v397_v18, %v266_v16  ;;  %v418_v34 = vadd.f32 %v417_v28, %v281_v23  ;;  %v257_v35 = vld [vmem:[%s1195_s11 + $0x50] sm:$0xff]  ;;  %v283_v36 = vld [vmem:[%s1195_s11 + $0x120] sm:$0xff]  ;;  %v270_v39 = vld [vmem:[%s1195_s11 + $0xb8] sm:$0xff] }
  0x64   : > { %v295_v40 = vld [vmem:[%s1195_s11 + $0x180] sm:$0xff]  ;;  %v296_v41 = vld [vmem:[%s1195_s11 + $0x188] sm:$0xff]  ;;  %v297_v44 = vld [vmem:[%s1195_s11 + $0x190] sm:$0xff] }
  0x65   : > { %v379_v17 = vadd.f32 %v378_v13, %v252_v10  ;;  %v399_v31 = vadd.f32 %v398_v25, %v267_v20  ;;  %v419_v42 = vadd.f32 %v418_v34, %v282_v29  ;;  %v284_v43 = vld [vmem:[%s1195_s11 + $0x128] sm:$0xff]  ;;  %v438_v47 = vadd.f32 %v296_v41, %v295_v40  ;;  %v258_v48 = vld [vmem:[%s1195_s11 + $0x58] sm:$0xff]  ;;  %v271_v49 = vld [vmem:[%s1195_s11 + $0xc0] sm:$0xff] }
  0x66   : > { %v298_v50 = vld [vmem:[%s1195_s11 + $0x198] sm:$0xff]  ;;  %v285_v52 = vld [vmem:[%s1195_s11 + $0x130] sm:$0xff]  ;;  %v259_v56 = vld [vmem:[%s1195_s11 + $0x60] sm:$0xff] }
  0x67   : > { %v380_v24 = vadd.f32 %v379_v17, %v253_v15  ;;  %v400_v38 = vadd.f32 %v399_v31, %v268_v27  ;;  %v420_v51 = vadd.f32 %v419_v42, %v283_v36  ;;  %v439_v55 = vadd.f32 %v438_v47, %v297_v44  ;;  %v272_v57 = vld [vmem:[%s1195_s11 + $0xc8] sm:$0xff]  ;;  %v299_v58 = vld [vmem:[%s1195_s11 + $0x1a0] sm:$0xff]  ;;  %v273_v60 = vld [vmem:[%s1195_s11 + $0xd0] sm:$0xff] }
  0x68   : > { %v286_v61 = vld [vmem:[%s1195_s11 + $0x138] sm:$0xff]  ;;  %v311_v62 = vld [vmem:[%s1195_s11 + $0x200] sm:$0xff]  ;;  %v300_v2 = vld [vmem:[%s1195_s11 + $0x1a8] sm:$0xff] }
  0x69   : > { %v381_v30 = vadd.f32 %v380_v24, %v254_v19  ;;  %v401_v46 = vadd.f32 %v400_v38, %v269_v33  ;;  %v421_v59 = vadd.f32 %v420_v51, %v284_v43  ;;  %v440_v1 = vadd.f32 %v439_v55, %v298_v50  ;;  %v312_v3 = vld [vmem:[%s1195_s11 + $0x208] sm:$0xff]  ;;  %v313_v4 = vld [vmem:[%s1195_s11 + $0x210] sm:$0xff]  ;;  %v287_v7 = vld [vmem:[%s1195_s11 + $0x140] sm:$0xff] }
  0x6a   : > { %v260_v6 = vld [vmem:[%s1195_s11 + $0x68] sm:$0xff]  ;;  %v459_v11 = vadd.f32 %v312_v3, %v311_v62  ;;  %v274_v12 = vld [vmem:[%s1195_s11 + $0xd8] sm:$0xff]  ;;  %v301_v13 = vld [vmem:[%s1195_s11 + $0x1b0] sm:$0xff] }
  0x6b   : > { %v382_v37 = vadd.f32 %v381_v30, %v255_v26  ;;  %v402_v54 = vadd.f32 %v401_v46, %v270_v39  ;;  %v422_v5 = vadd.f32 %v421_v59, %v285_v52  ;;  %v441_v10 = vadd.f32 %v440_v1, %v299_v58  ;;  %v314_v14 = vld [vmem:[%s1195_s11 + $0x218] sm:$0xff]  ;;  %v275_v16 = vld [vmem:[%s1195_s11 + $0xe0] sm:$0xff]  ;;  %v288_v17 = vld [vmem:[%s1195_s11 + $0x148] sm:$0xff] }
  0x6c   : > { %v460_v20 = vadd.f32 %v459_v11, %v313_v4  ;;  %v261_v21 = vld [vmem:[%s1195_s11 + $0x70] sm:$0xff]  ;;  %v302_v23 = vld [vmem:[%s1195_s11 + $0x1b8] sm:$0xff]  ;;  %v315_v24 = vld [vmem:[%s1195_s11 + $0x220] sm:$0xff] }
  0x6d   : > { %v383_v45 = vadd.f32 %v382_v37, %v256_v32  ;;  %v403_v0 = vadd.f32 %v402_v54, %v271_v49  ;;  %v423_v15 = vadd.f32 %v422_v5, %v286_v61  ;;  %v442_v19 = vadd.f32 %v441_v10, %v300_v2  ;;  %v289_v22 = vld [vmem:[%s1195_s11 + $0x150] sm:$0xff]  ;;  %v327_v26 = vld [vmem:[%s1195_s11 + $0x280] sm:$0xff]  ;;  %v328_v27 = vld [vmem:[%s1195_s11 + $0x288] sm:$0xff] }
  0x6e   : > { %v329_v28 = vld [vmem:[%s1195_s11 + $0x290] sm:$0xff]  ;;  %v461_v32 = vadd.f32 %v460_v20, %v314_v14  ;;  %v276_v33 = vld [vmem:[%s1195_s11 + $0xe8] sm:$0xff]  ;;  %v303_v34 = vld [vmem:[%s1195_s11 + $0x1c0] sm:$0xff]  ;;  %v480_v37 = vadd.f32 %v328_v27, %v327_v26 }
  0x6f   : > { %v384_v53 = vadd.f32 %v383_v45, %v257_v35  ;;  %v404_v9 = vadd.f32 %v403_v0, %v272_v57  ;;  %v424_v25 = vadd.f32 %v423_v15, %v287_v7  ;;  %v443_v31 = vadd.f32 %v442_v19, %v301_v13  ;;  %v316_v35 = vld [vmem:[%s1195_s11 + $0x228] sm:$0xff]  ;;  %v277_v38 = vld [vmem:[%s1195_s11 + $0xf0] sm:$0xff]  ;;  %v290_v39 = vld [vmem:[%s1195_s11 + $0x158] sm:$0xff] }
  0x70   : > { %v330_v40 = vld [vmem:[%s1195_s11 + $0x298] sm:$0xff]  ;;  %v462_v43 = vadd.f32 %v461_v32, %v315_v24  ;;  %v304_v46 = vld [vmem:[%s1195_s11 + $0x1c8] sm:$0xff]  ;;  %v317_v47 = vld [vmem:[%s1195_s11 + $0x230] sm:$0xff]  ;;  %v481_v49 = vadd.f32 %v480_v37, %v329_v28 }
  0x71   : > { %v385_v63 = vadd.f32 %v384_v53, %v258_v48  ;;  %v405_v18 = vadd.f32 %v404_v9, %v273_v60  ;;  %v425_v36 = vadd.f32 %v424_v25, %v288_v17  ;;  %v444_v42 = vadd.f32 %v443_v31, %v302_v23  ;;  %v262_v44 = vld [vmem:[%s1195_s11 + $0x78] sm:$0xff]  ;;  %v291_v50 = vld [vmem:[%s1195_s11 + $0x160] sm:$0xff]  ;;  %v305_v51 = vld [vmem:[%s1195_s11 + $0x1d0] sm:$0xff] }
  0x72   : > { %v278_v45 = vld [vmem:[%s1195_s11 + $0xf8] sm:$0xff]  ;;  %v331_v52 = vld [vmem:[%s1195_s11 + $0x2a0] sm:$0xff]  ;;  %v344_v59 = vld [vmem:[%s1195_s11 + $0x308] sm:$0xff]  ;;  %v482_v61 = vadd.f32 %v481_v49, %v330_v40 }
  0x73   : > { %v386_v8 = vadd.f32 %v385_v63, %v259_v56  ;;  %v406_v30 = vadd.f32 %v405_v18, %v274_v12  ;;  %v426_v48 = vadd.f32 %v425_v36, %v289_v22  ;;  %v445_v55 = vadd.f32 %v444_v42, %v303_v34  ;;  %v318_v57 = vld [vmem:[%s1195_s11 + $0x238] sm:$0xff]  ;;  %v343_v58 = vld [vmem:[%s1195_s11 + $0x300] sm:$0xff]  ;;  %v292_v62 = vld [vmem:[%s1195_s11 + $0x168] sm:$0xff] }
  0x74   : > { %v463_v56 = vadd.f32 %v462_v43, %v316_v35  ;;  %v332_v63 = vld [vmem:[%s1195_s11 + $0x2a8] sm:$0xff]  ;;  %v345_v0 = vld [vmem:[%s1195_s11 + $0x310] sm:$0xff]  ;;  %v306_v4 = vld [vmem:[%s1195_s11 + $0x1d8] sm:$0xff]  ;;  %v483_v7 = vadd.f32 %v482_v61, %v331_v52 }
  0x75   : > { %v387_v29 = vadd.f32 %v386_v8, %v260_v6  ;;  %v407_v41 = vadd.f32 %v406_v30, %v275_v16  ;;  %v427_v60 = vadd.f32 %v426_v48, %v290_v39  ;;  %v446_v2 = vadd.f32 %v445_v55, %v304_v46  ;;  %v319_v5 = vld [vmem:[%s1195_s11 + $0x240] sm:$0xff]  ;;  %v293_v9 = vld [vmem:[%s1195_s11 + $0x170] sm:$0xff]  ;;  %v346_v11 = vld [vmem:[%s1195_s11 + $0x318] sm:$0xff] }
  0x76   : > { %v464_v3 = vadd.f32 %v463_v56, %v317_v47  ;;  %v501_v8 = vadd.f32 %v344_v59, %v343_v58  ;;  %v333_v10 = vld [vmem:[%s1195_s11 + $0x2b0] sm:$0xff]  ;;  %v294_v16 = vld [vmem:[%s1195_s11 + $0x178] sm:$0xff]  ;;  %v307_v17 = vld [vmem:[%s1195_s11 + $0x1e0] sm:$0xff]  ;;  %v484_v20 = vadd.f32 %v483_v7, %v332_v63 }
  0x77   : > { %v388_v53 = vadd.f32 %v387_v29, %v261_v21  ;;  %v408_v54 = vadd.f32 %v407_v41, %v276_v33  ;;  %v428_v6 = vadd.f32 %v427_v60, %v291_v50  ;;  %v447_v14 = vadd.f32 %v446_v2, %v305_v51  ;;  %v320_v18 = vld [vmem:[%s1195_s11 + $0x248] sm:$0xff]  ;;  %v334_v22 = vld [vmem:[%s1195_s11 + $0x2b8] sm:$0xff]  ;;  %v347_v23 = vld [vmem:[%s1195_s11 + $0x320] sm:$0xff] }
  0x78   : > { %v465_v15 = vadd.f32 %v464_v3, %v318_v57  ;;  %v502_v21 = vadd.f32 %v501_v8, %v345_v0  ;;  %v359_v24 = vld [vmem:[%s1195_s11 + $0x380] sm:$0xff]  ;;  %v308_v27 = vld [vmem:[%s1195_s11 + $0x1e8] sm:$0xff]  ;;  %v321_v28 = vld [vmem:[%s1195_s11 + $0x250] sm:$0xff]  ;;  %v485_v31 = vadd.f32 %v484_v20, %v333_v10 }
  0x79   : > { %v409_v1 = vadd.f32 %v408_v54, %v277_v38  ;;  %v389_v12 = vadd.f32 %v388_v53, %v262_v44  ;;  %v429_v19 = vadd.f32 %v428_v6, %v292_v62  ;;  %v448_v25 = vadd.f32 %v447_v14, %v306_v4  ;;  %v360_v29 = vld [vmem:[%s1195_s11 + $0x388] sm:$0xff]  ;;  %v335_v33 = vld [vmem:[%s1195_s11 + $0x2c0] sm:$0xff]  ;;  %v361_v35 = vld [vmem:[%s1195_s11 + $0x390] sm:$0xff] }
  0x7a   : > { %v466_v26 = vadd.f32 %v465_v15, %v319_v5  ;;  %v503_v32 = vadd.f32 %v502_v21, %v346_v11  ;;  %v348_v34 = vld [vmem:[%s1195_s11 + $0x328] sm:$0xff]  ;;  %v309_v40 = vld [vmem:[%s1195_s11 + $0x1f0] sm:$0xff]  ;;  %v322_v41 = vld [vmem:[%s1195_s11 + $0x258] sm:$0xff]  ;;  %v486_v43 = vadd.f32 %v485_v31, %v334_v22 }
  0x7b   : > { %v410_v13 = vadd.f32 %v409_v1, %v278_v45  ;;  %v430_v30 = vadd.f32 %v429_v19, %v293_v9  ;;  %v390_v36 = vrot.slane %v389_v12, 4  ;;  %v449_v38 = vadd.f32 %v448_v25, %v307_v17  ;;  %v336_v46 = vld [vmem:[%s1195_s11 + $0x2c8] sm:$0xff]  ;;  %v349_v47 = vld [vmem:[%s1195_s11 + $0x330] sm:$0xff]  ;;  %v362_v48 = vld [vmem:[%s1195_s11 + $0x398] sm:$0xff] }
  0x7c   : > { %v467_v39 = vadd.f32 %v466_v26, %v320_v18  ;;  %v504_v44 = vadd.f32 %v503_v32, %v347_v23  ;;  %v522_v45 = vadd.f32 %v360_v29, %v359_v24  ;;  %v310_v51 = vld [vmem:[%s1195_s11 + $0x1f8] sm:$0xff]  ;;  %v323_v52 = vld [vmem:[%s1195_s11 + $0x260] sm:$0xff]  ;;  %v487_v53 = vadd.f32 %v486_v43, %v335_v33  ;;  %v337_v56 = vld [vmem:[%s1195_s11 + $0x2d0] sm:$0xff] }
  0x7d   : > { %v411_v37 = vrot.slane %v410_v13, 4  ;;  %v431_v42 = vadd.f32 %v430_v30, %v294_v16  ;;  %v450_v49 = vadd.f32 %v449_v38, %v308_v27  ;;  %v350_v57 = vld [vmem:[%s1195_s11 + $0x338] sm:$0xff]  ;;  %v363_v58 = vld [vmem:[%s1195_s11 + $0x3a0] sm:$0xff]  ;;  %v391_v59 = vadd.f32 %v390_v36, %v389_v12  ;;  %v324_v63 = vld [vmem:[%s1195_s11 + $0x268] sm:$0xff] }
  0x7e   : > { %v468_v50 = vadd.f32 %v467_v39, %v321_v28  ;;  %v505_v54 = vadd.f32 %v504_v44, %v348_v34  ;;  %v523_v55 = vadd.f32 %v522_v45, %v361_v35  ;;  %v488_v1 = vadd.f32 %v487_v53, %v336_v46  ;;  %v338_v4 = vld [vmem:[%s1195_s11 + $0x2d8] sm:$0xff]  ;;  %v351_v5 = vld [vmem:[%s1195_s11 + $0x340] sm:$0xff]  ;;  %v364_v6 = vld [vmem:[%s1195_s11 + $0x3a8] sm:$0xff] }
  0x7f   : > { %v432_v60 = vrot.slane %v431_v42, 4  ;;  %v451_v61 = vadd.f32 %v450_v49, %v309_v40  ;;  %v412_v0 = vadd.f32 %v411_v37, %v410_v13  ;;  %v325_v9 = vld [vmem:[%s1195_s11 + $0x270] sm:$0xff]  ;;  %v339_v14 = vld [vmem:[%s1195_s11 + $0x2e0] sm:$0xff]  ;;  %v352_v15 = vld [vmem:[%s1195_s11 + $0x348] sm:$0xff]  ;;  %v392_v13 = vrot.slane %v391_v59, 2 }
  0x80   : > { %v469_v62 = vadd.f32 %v468_v50, %v322_v41  ;;  %v506_v2 = vadd.f32 %v505_v54, %v349_v47  ;;  %v524_v3 = vadd.f32 %v523_v55, %v362_v48  ;;  %v489_v10 = vadd.f32 %v488_v1, %v337_v56  ;;  %v365_v16 = vld [vmem:[%s1195_s11 + $0x3b0] sm:$0xff]  ;;  %v326_v20 = vld [vmem:[%s1195_s11 + $0x278] sm:$0xff]  ;;  %v340_v25 = vld [vmem:[%s1195_s11 + $0x2e8] sm:$0xff] }
  0x81   : > { %v452_v7 = vadd.f32 %v451_v61, %v310_v51  ;;  %v433_v17 = vadd.f32 %v432_v60, %v431_v42  ;;  %v413_v21 = vrot.slane %v412_v0, 2  ;;  %v353_v26 = vld [vmem:[%s1195_s11 + $0x350] sm:$0xff]  ;;  %v366_v27 = vld [vmem:[%s1195_s11 + $0x3b8] sm:$0xff]  ;;  %v367_v35 = vld [vmem:[%s1195_s11 + $0x3c0] sm:$0xff]  ;;  %v393_v36 = vadd.f32 %v392_v13, %v391_v59 }
  0x82   : > { %v470_v8 = vadd.f32 %v469_v62, %v323_v52  ;;  %v507_v11 = vadd.f32 %v506_v2, %v350_v57  ;;  %v525_v12 = vadd.f32 %v524_v3, %v363_v58  ;;  %v490_v22 = vadd.f32 %v489_v10, %v338_v4  ;;  %v341_v33 = vld [vmem:[%s1195_s11 + $0x2f0] sm:$0xff]  ;;  %v354_v34 = vld [vmem:[%s1195_s11 + $0x358] sm:$0xff]  ;;  %v355_v44 = vld [vmem:[%s1195_s11 + $0x360] sm:$0xff] }
  0x83   : > { %v453_v18 = vrot.slane %v452_v7, 4  ;;  %v434_v37 = vrot.slane %v433_v17, 2  ;;  %v414_v39 = vadd.f32 %v413_v21, %v412_v0  ;;  %v342_v43 = vld [vmem:[%s1195_s11 + $0x2f8] sm:$0xff]  ;;  %v368_v45 = vld [vmem:[%s1195_s11 + $0x3c8] sm:$0xff]  ;;  %v369_v52 = vld [vmem:[%s1195_s11 + $0x3d0] sm:$0xff]  ;;  %v394_v53 = vrot.slane %v393_v36, 1 }
  0x84   : > { %v471_v19 = vadd.f32 %v470_v8, %v324_v63  ;;  %v508_v23 = vadd.f32 %v507_v11, %v351_v5  ;;  %v526_v24 = vadd.f32 %v525_v12, %v364_v6  ;;  %v491_v30 = vadd.f32 %v490_v22, %v339_v14  ;;  %v356_v51 = vld [vmem:[%s1195_s11 + $0x368] sm:$0xff]  ;;  %v357_v60 = vld [vmem:[%s1195_s11 + $0x370] sm:$0xff]  ;;  %v370_v61 = vld [vmem:[%s1195_s11 + $0x3d8] sm:$0xff] }
  0x85   : > { %v454_v29 = vadd.f32 %v453_v18, %v452_v7  ;;  %v435_v54 = vadd.f32 %v434_v37, %v433_v17  ;;  %v415_v56 = vrot.slane %v414_v39, 1  ;;  %v358_v3 = vld [vmem:[%s1195_s11 + $0x378] sm:$0xff]  ;;  %v371_v4 = vld [vmem:[%s1195_s11 + $0x3e0] sm:$0xff]  ;;  %v395_v5 = vadd.f32 %v394_v53, %v393_v36  ;;  %v372_v11 = vld [vmem:[%s1195_s11 + $0x3e8] sm:$0xff] }
  0x86   : > { %v472_v28 = vadd.f32 %v471_v19, %v325_v9  ;;  %v509_v31 = vadd.f32 %v508_v23, %v352_v15  ;;  %v527_v32 = vadd.f32 %v526_v24, %v365_v16  ;;  %v492_v40 = vadd.f32 %v491_v30, %v340_v25  ;;  %v373_v17 = vld [vmem:[%s1195_s11 + $0x3f0] sm:$0xff]  ;;  %v374_v23 = vld [vmem:[%s1195_s11 + $0x3f8] sm:$0xff] }
  0x87   : > { %v455_v47 = vrot.slane %v454_v29, 2  ;;  %v436_v6 = vrot.slane %v435_v54, 1  ;;  %v416_v7 = vadd.f32 %v415_v56, %v414_v39  ;;  %v1058_v53 = vmov (!%p764_p0), 0.0|0.0  }
  0x88   : > { %v473_v38 = vadd.f32 %v472_v28, %v326_v20  ;;  %v510_v41 = vadd.f32 %v509_v31, %v353_v26  ;;  %v528_v42 = vadd.f32 %v527_v32, %v366_v27  ;;  %v493_v48 = vadd.f32 %v492_v40, %v341_v33  ;;  %823 = vmatprep.subr.bf16.mxu0 (!%p764_p0), %v1058_v53 }
  0x89   : > { %v456_v63 = vadd.f32 %v455_v47, %v454_v29  ;;  %v437_v18 = vadd.f32 %v436_v6, %v435_v54  ;;  %v552_v22 = vsel %vm551_vm0, %v416_v7, %v395_v5  ;;  %v1060_v56 = vmov (!%p764_p0), 0.0   ;;  %v586_v6 = vld [vmem:[#allocation6 + $0x60] sm:$0xff] (!%p764_p0)  ;;  %v587_v7 = vld [vmem:[#allocation6 + $0x68] sm:$0xff] (!%p764_p0) }
  0x8a   : > { %v474_v46 = vrot.slane %v473_v38, 4  ;;  %v511_v49 = vadd.f32 %v510_v41, %v354_v34  ;;  %v529_v50 = vadd.f32 %v528_v42, %v367_v35  ;;  %v494_v57 = vadd.f32 %v493_v48, %v342_v43  ;;  %820 = vmatprep.mubr.msk.f32.mxu0 (!%p764_p0), %vm1059_vm7, %v1060_v56 }
  0x8b   : > { %v457_v14 = vrot.slane %v456_v63, 1  ;;  %v554_v28 = vsel %vm553_vm1, %v437_v18, %v552_v22 }
  0x8c   : > { %v475_v55 = vadd.f32 %v474_v46, %v473_v38  ;;  %v512_v58 = vadd.f32 %v511_v49, %v355_v44  ;;  %v530_v59 = vadd.f32 %v529_v50, %v368_v45  ;;  %v495_v0 = vrot.slane %v494_v57, 4  ;;  %v246_v46 = vld [vmem:[#allocation2] sm:$0xff]  ;;  %v574_v50 = vld [vmem:[#allocation6] sm:$0xff] (!%p764_p0) }
  0x8d   : > { %v458_v25 = vadd.f32 %v457_v14, %v456_v63 }
  0x8e   : > { %v476_v62 = vrot.slane %v475_v55, 2  ;;  %v513_v1 = vadd.f32 %v512_v58, %v356_v51  ;;  %v531_v2 = vadd.f32 %v530_v59, %v369_v52  ;;  %v496_v8 = vadd.f32 %v495_v0, %v494_v57  ;;  %v575_v51 = vld [vmem:[#allocation6 + $0x8] sm:$0xff] (!%p764_p0)  ;;  %v576_v52 = vld [vmem:[#allocation6 + $0x10] sm:$0xff] (!%p764_p0)  ;;  %v578_v58 = vld [vmem:[#allocation6 + $0x20] sm:$0xff] (!%p764_p0) }
  0x8f   : > { %v556_v35 = vsel %vm555_vm2, %v458_v25, %v554_v28  ;;  %v824_v54 = vpack.c.bf16 (!%p764_p0), %v575_v51, %v574_v50  ;;  %v579_v59 = vld [vmem:[#allocation6 + $0x28] sm:$0xff] (!%p764_p0)  ;;  %v582_v0 = vld [vmem:[#allocation6 + $0x40] sm:$0xff] (!%p764_p0) }
  0x90   : > { %v514_v9 = vadd.f32 %v513_v1, %v357_v60  ;;  %v532_v10 = vadd.f32 %v531_v2, %v370_v61  ;;  %v477_v12 = vadd.f32 %v476_v62, %v475_v55  ;;  %v497_v15 = vrot.slane %v496_v8, 2  ;;  %v577_v55 = vld [vmem:[#allocation6 + $0x18] sm:$0xff] (!%p764_p0)  ;;  %v580_v61 = vld [vmem:[#allocation6 + $0x30] sm:$0xff] (!%p764_p0)  ;;  %v583_v1 = vld [vmem:[#allocation6 + $0x48] sm:$0xff] (!%p764_p0) }
  0x91   : > { %825 = vmatpush3.bf16.msra.mxu0 (!%p764_p0), %v824_v54  ;;  %v827_v57 = vpack.c.bf16 (!%p764_p0), %v577_v55, %v576_v52  ;;  %v830_v60 = vpack.c.bf16 (!%p764_p0), %v579_v59, %v578_v58  ;;  %v581_v62 = vld [vmem:[#allocation6 + $0x38] sm:$0xff] (!%p764_p0)  ;;  %v836_v2 = vpack.c.bf16 (!%p764_p0), %v583_v1, %v582_v0 }
  0x92   : > { %v515_v16 = vadd.f32 %v514_v9, %v358_v3  ;;  %v533_v13 = vadd.f32 %v532_v10, %v371_v4  ;;  %v498_v19 = vadd.f32 %v497_v15, %v496_v8  ;;  %v478_v24 = vrot.slane %v477_v12, 1  ;;  %826 = vmatprep.subr.bf16.mxu0 (!%p764_p0), %v1058_v53  ;;  %v584_v3 = vld [vmem:[#allocation6 + $0x50] sm:$0xff] (!%p764_p0)  ;;  %v585_v4 = vld [vmem:[#allocation6 + $0x58] sm:$0xff] (!%p764_p0) }
  0x93   : > { %v833_v63 = vpack.c.bf16 (!%p764_p0), %v581_v62, %v580_v61  ;;  %v839_v5 = vpack.c.bf16 (!%p764_p0), %v585_v4, %v584_v3  ;;  %v842_v8 = vpack.c.bf16 (!%p764_p0), %v587_v7, %v586_v6  ;;  %v588_v9 = vld [vmem:[#allocation6 + $0x70] sm:$0xff] (!%p764_p0)  ;;  %v589_v10 = vld [vmem:[#allocation6 + $0x78] sm:$0xff] (!%p764_p0) }
  0x94   : > { %v516_v20 = vrot.slane %v515_v16, 4  ;;  %v534_v21 = vadd.f32 %v533_v13, %v372_v11  ;;  %v499_v29 = vrot.slane %v498_v19, 1  ;;  %v479_v32 = vadd.f32 %v478_v24, %v477_v12  ;;  %v765_v15 = vld [vmem:[%s1386_s2] ss:$0 sm:$0xff] (!%p764_p0) }
  0x95   : > { %828 = vmatpush3.bf16.msra.mxu0 (!%p764_p0), %v827_v57  ;;  %v845_v11 = vpack.c.bf16 (!%p764_p0), %v589_v10, %v588_v9 }
  0x96   : > { %v517_v26 = vadd.f32 %v516_v20, %v515_v16  ;;  %v535_v27 = vadd.f32 %v534_v21, %v373_v17  ;;  %v500_v36 = vadd.f32 %v499_v29, %v498_v19  ;;  %v558_v39 = vsel %vm557_vm3, %v479_v32, %v556_v35  ;;  %829 = vmatprep.subr.bf16.mxu0 (!%p764_p0), %v1058_v53 }
  0x98   : > { %v518_v30 = vrot.slane %v517_v26, 2  ;;  %v536_v31 = vadd.f32 %v535_v27, %v374_v23  ;;  %v560_v43 = vsel %vm559_vm4, %v500_v36, %v558_v39 }
  0x99   : > { %831 = vmatpush3.bf16.msra.mxu0 (!%p764_p0), %v830_v60 }
  0x9a   : > { %v519_v33 = vadd.f32 %v518_v30, %v517_v26  ;;  %v537_v34 = vrot.slane %v536_v31, 4  ;;  %832 = vmatprep.subr.bf16.mxu0 (!%p764_p0), %v1058_v53 }
  0x9c   : > { %v520_v37 = vrot.slane %v519_v33, 1  ;;  %v538_v38 = vadd.f32 %v537_v34, %v536_v31 }
  0x9d   : > { %834 = vmatpush3.bf16.msra.mxu0 (!%p764_p0), %v833_v63 }
  0x9e   : > { %v539_v40 = vrot.slane %v538_v38, 2  ;;  %v521_v41 = vadd.f32 %v520_v37, %v519_v33  ;;  %835 = vmatprep.subr.bf16.mxu0 (!%p764_p0), %v1058_v53 }
  0xa0   : > { %v540_v42 = vadd.f32 %v539_v40, %v538_v38  ;;  %v562_v45 = vsel %vm561_vm5, %v521_v41, %v560_v43 }
  0xa1   : > { %837 = vmatpush3.bf16.msra.mxu0 (!%p764_p0), %v836_v2 }
  0xa2   : > { %v541_v44 = vrot.slane %v540_v42, 1  ;;  %838 = vmatprep.subr.bf16.mxu0 (!%p764_p0), %v1058_v53 }
  0xa3   : > { %571 = sbr.rel (%p764_p0) target bundleno = 394 (0x18a), region = 48 }
  0xa4   : > { %v542_v47 = vadd.f32 %v541_v44, %v540_v42 }
  0xa5   : > { %840 = vmatpush3.bf16.msra.mxu0 (!%p764_p0), %v839_v5 }
  0xa6   : > { %v564_v48 = vsel %vm563_vm6, %v542_v47, %v562_v45  ;;  %841 = vmatprep.subr.bf16.mxu0 (!%p764_p0), %v1058_v53 }
  0xa7   : > { %v566_v49 = vadd.f32 %v564_v48, %v246_v46 }
  0xa9   : > { %567 = vst [vmem:[#allocation2] sm:$0xff] %v566_v49  ;;  %843 = vmatpush3.bf16.msra.mxu0 (!%p764_p0), %v842_v8 }
  0xaa   : > { %844 = vmatprep.subr.bf16.mxu0 %v1058_v53 }
  0xad   : > { %846 = vmatpush3.bf16.msra.mxu0 %v845_v11 }
  0xb0   : > { %v572_v12 = vld [vmem:[#allocation2] sm:$0xff] }
  0xb1   : > { %v573_v14 = vmul.f32 0.00390625, %v572_v12 }
  0xb3   : > { %821 = vmatmul.mubr.f32.vlgmr.msra.gmra.mrb[0].mxu0 %v573_v14 }
 0x186   : > { %v663_v16 = vpop.f32.mrb[0].mxu0 }
 0x187   : > { %v664_v13 = vadd.f32 %v765_v15, %v663_v16  ;;  %v822_v17 = vpop.f32.mrb[1].mxu0 }
 0x189   : > { %667 = vst [vmem:[#allocation8] sm:$0xff] %v664_v13 }
 0x18a PF: > { %p1340_p1 = scmp.eq.s32.totalorder %s751_s18, 1  ;;  %s1061_s24 = smov [#allocation8]  }
 0x18b   : > { %s677_s26 = sshll.u32 %s1061_s24, 4  ;;  %s678_s26 = int_to_ptr.vmem [resolvable:$true] %s677_s26 }
 0x18c   : > { %s962_s27 = scalar_lea.vmem %s678_s26, 128  ;;  %p969_p7 = scmp.lt.s32.totalorder %s678_s26, %s678_s26 }
 0x18d   : > { %p963_p2 = scmp.ne.s32.totalorder %s678_s26, %s962_s27  ;;  %p970_p9 = scmp.lt.s32.totalorder %s962_s27, %s962_s27 }
 0x18f   : > { %p964_p4 = pnand %p963_p2, %p1340_p1  ;;  %p971_p11 = por %p970_p9, %p969_p7 }
 0x191   : > { %p965_p6 = pneg %p964_p4 }
 0x193   : > { %p972_p13 = pnand %p971_p11, %p965_p6 }
 0x195   : > { %975 = shalt.err (!%p972_p13)
}
 0x196   : > { %s976_s18 = scalar_lea.hbm %s1387_s3, 128 }
 0x197   : > { %p977_p3 = scmp.ne.s32.totalorder %s1387_s3, %s976_s18  ;;  %p982_p10 = scmp.lt.u32.totalorder %s976_s18, %s1387_s3 }
 0x199   : > { %p978_p5 = pnand %p977_p3, %p1340_p1 }
 0x19b   : > { %p979_p8 = pneg %p978_p5 }
 0x19d   : > { %p984_p12 = pnand %p982_p10, %p979_p8 }
 0x19f   : > { %987 = shalt.err (!%p984_p12)
}
 0x1a0   : > { %861 = dma.vmem_to_hbm [thread:$0]  (%p1340_p1), %s678_s26, 128, %s1387_s3, [#allocation5]  }
 0x1a1   : > { %1021 = dma.done.wait (%p1340_p1), [#allocation5], 128  }
 0x1a2   : > { %1023 = vsyncadd (%p1340_p1), [#allocation5], 4294967168 }
 0x1a3 PF: > { %s18_s17 = sadd.s32 1, %s1046_s17   ;;  %s1403_s12 = smov %s1030_s13 }
 0x1a4   : > { %p15_p0 = scmp.ge.s32.totalorder %s18_s17, 4   ;;  %s1404_s13 = smov %s1034_s14 }
 0x1a5   : > { %s1405_s14 = smov %s1140_s25  ;;  %s1406_s15 = smov %s1042_s16 }
 0x1a6   : > { %s1407_s16 = smov %s1409_s19  ;;  %17 = sbr.rel (!%p15_p0) target bundleno = 6 (0x6), region = 87 }
 0x1ad   :  { %690 = vsyncpa [#allocation4], 1 }
 0x1ae   :  { %692 = vsyncpa [#allocation4 + $0x1], 1 }
 0x1af   :  { %693 = vsyncpa [#allocation7], 1 }
 0x1b0   :  { %694 = vsyncpa [#allocation5], 1 }
 0x1b1   :  { %696 = vsyncpa [#allocation5 + $0x1], 1 }

</bundles_post_ra>
